<compile_context>
chip_gen: v7x
topology: tpu7x:2x2x1
jax: 0.10.0
libtpu: 0.0.40
codegen_flags: <defaults>
</compile_context>

<pallas_src>
from functools import partial

import jax
import jax.numpy as jnp
import numpy as np
from jax import lax
from jax.experimental import pallas as pl
from jax.experimental.pallas import tpu as pltpu


def _round_up(x, m):
    return ((x + m - 1) // m) * m


def _length_regulator_kernel(cums_ref, x_ref, out_ref):
    # cums_ref: (1, 2, Tp) int32 -- row 0 = exclusive cumsum, row 1 = inclusive
    # x_ref   : (1, Tp, Hp)      -- whole (padded) source sequence, resident
    #                               across all l tiles (index map ignores l)
    # out_ref : (1, tile_L, Hp)  -- one tile of the expanded output; the ragged
    #                               last tile is masked on writeback by Pallas
    tile_l = out_ref.shape[1]
    l = pl.program_id(1)

    ecum = cums_ref[0, 0:1, :]                                     # (1, Tp)
    cum = cums_ref[0, 1:2, :]                                      # (1, Tp)

    # global output-row indices covered by this tile
    j = l * tile_l + lax.broadcasted_iota(jnp.int32, (tile_l, 1), 0)

    # one-hot selection built directly in the compute dtype (0/1 exact in bf16):
    # row j picks source token i iff ecum[i] <= j < cum[i]
    onehot = jnp.logical_and(j >= ecum, j < cum).astype(x_ref.dtype)  # (tile_L, Tp)

    # gather-as-matmul on the MXU; each output row selects at most one x row,
    # so the result is exact (f32 path verified exact on-device; bf16 path is
    # exact by construction since 1.0 * bf16 is exact).
    out_ref[0] = jnp.dot(
        onehot, x_ref[0], preferred_element_type=jnp.float32
    ).astype(out_ref.dtype)


@partial(jax.jit, static_argnames=("max_len", "tile_l", "compute_dtype"))
def _length_regulator_fixed(x, duration, *, max_len, tile_l, compute_dtype):
    B, T, H = x.shape
    out_dtype = x.dtype if compute_dtype is None else jnp.dtype(compute_dtype)
    dsize = jnp.dtype(out_dtype).itemsize

    # Only pad H when it is not already lane-aligned, so the post-kernel slice
    # is an identity for aligned H (no extra HBM pass over the big output).
    Hp = H if H % 128 == 0 else _round_up(H, 128)
    Tp = T if T % 128 == 0 else _round_up(T, 128)

    tile_l_eff = _round_up(max(8, min(int(tile_l), _round_up(max_len, 8))), 8)
    n_l = pl.cdiv(max_len, tile_l_eff)          # ragged last block is masked

    # clamp durations (negative values would break the one-hot invariant)
    dur = jnp.maximum(duration.astype(jnp.int32), 0)
    dur_p = dur if Tp == T else jnp.pad(dur, ((0, 0), (0, Tp - T)))
    cum = jnp.cumsum(dur_p, axis=1)                         # inclusive, (B, Tp)
    ecum = cum - dur_p                                      # exclusive, (B, Tp)
    total = cum[:, -1]                                      # true expanded lengths
    cumstack = jnp.stack([ecum, cum], axis=1)               # (B, 2, Tp) -- tiny DMA

    x_c = x.astype(out_dtype)                               # optional bf16 path
    x_p = x_c if (Tp == T and Hp == H) else jnp.pad(
        x_c, ((0, 0), (0, Tp - T), (0, Hp - H)))

    # Explicit VMEM budget: double-buffered x / cums / out blocks + one-hot +
    # f32 accumulator, with ~1.5x headroom (scoped defaults are 16/32 MiB).
    est = (2 * Tp * Hp * dsize            # x block (double-buffered)
           + 2 * 2 * Tp * 4               # cumsum block (double-buffered)
           + 2 * tile_l_eff * Hp * dsize  # out block (double-buffered)
           + tile_l_eff * Tp * dsize      # one-hot gather matrix
           + tile_l_eff * Hp * 4)         # f32 matmul accumulator
    vmem_limit = int(min(max(est * 3 // 2 + (2 << 20), 32 << 20), 112 << 20))

    cost = pl.CostEstimate(
        flops=2 * B * n_l * tile_l_eff * Tp * Hp,
        transcendentals=0,
        bytes_accessed=B * max_len * Hp * dsize + B * Tp * Hp * dsize + B * 2 * Tp * 4,
    )

    out_p = pl.pallas_call(
        _length_regulator_kernel,
        out_shape=jax.ShapeDtypeStruct((B, max_len, Hp), out_dtype),
        grid_spec=pltpu.PrefetchScalarGridSpec(
            num_scalar_prefetch=0,
            grid=(B, n_l),
            in_specs=[
                # cumsums and x stay resident across the l tiles (no l dep)
                pl.BlockSpec((1, 2, Tp), lambda b, l: (b, 0, 0)),
                pl.BlockSpec((1, Tp, Hp), lambda b, l: (b, 0, 0)),
            ],
            out_specs=pl.BlockSpec((1, tile_l_eff, Hp), lambda b, l: (b, l, 0)),
        ),
        compiler_params=pltpu.CompilerParams(
            dimension_semantics=("parallel", "parallel"),
            vmem_limit_bytes=vmem_limit,
        ),
        cost_estimate=cost,
    )(cumstack, x_p)

    # Identity when H is lane-aligned; only the H pad (never L) is sliced off.
    output = out_p if Hp == H else out_p[:, :, :H]

    # mel positions in plain JAX (lane-dense, no in-kernel (L, 1) store)
    idx = jnp.arange(1, max_len + 1, dtype=jnp.int32)[None, :]        # (1, L)
    mel_pos = jnp.where(idx <= total[:, None], idx, jnp.zeros_like(idx))
    return output, mel_pos


def length_regulator(x, duration, max_length=None, tile_l=512, compute_dtype=None):
    """x: [B, T, H], duration: [B, T] int -> (output [B, L, H], mel_pos [B, L]).

    compute_dtype=jnp.bfloat16 enables the reduced-precision path (halves HBM
    bytes and MXU passes); default preserves x.dtype exactly.
    tile_l is sweepable (512 default; 1024 is typically fine on v6e's 128 MiB
    VMEM, re-check the budget before carrying it to v7x's 64 MiB).
    """
    if max_length is None:
        # TODO(synk): data-dependent output length; this branch forces one
        # device->host sync. Pass a static max_length to stay fully jittable.
        dur_host = np.asarray(jax.device_get(duration)).astype(np.int64)
        max_len = int(np.maximum(dur_host, 0).sum(axis=1).max())
    else:
        max_len = int(max_length)
    if max_len <= 0:
        B, _, H = x.shape
        out_dt = x.dtype if compute_dtype is None else jnp.dtype(compute_dtype)
        return jnp.zeros((B, 0, H), out_dt), jnp.zeros((B, 0), jnp.int32)
    return _length_regulator_fixed(
        x, duration, max_len=max_len, tile_l=int(tile_l), compute_dtype=compute_dtype)


def _reference(x, duration):
    """Pure-numpy reference matching the PyTorch LengthRegulator (max_length=None)."""
    x = np.asarray(x)
    duration = np.asarray(duration)
    B, T, H = x.shape
    expanded = []
    for b in range(B):
        rows = []
        for i in range(T):
            rows.append(np.repeat(x[b, i:i + 1, :], int(duration[b, i]), axis=0))
        expanded.append(np.concatenate(rows, axis=0) if rows else np.zeros((0, H), x.dtype))
    max_len = max(e.shape[0] for e in expanded)
    out = np.zeros((B, max_len, H), dtype=x.dtype)
    pos = np.zeros((B, max_len), dtype=np.int32)
    for b, e in enumerate(expanded):
        out[b, :e.shape[0]] = e
        pos[b, :e.shape[0]] = np.arange(1, e.shape[0] + 1, dtype=np.int32)
    return out, pos


if __name__ == "__main__":
    key = jax.random.PRNGKey(0)
    kx, kx2, kd2 = jax.random.split(key, 3)

    # --- small shape matching the module (B=2, T=8, H=32), f32 path ----------
    B, T, H = 2, 8, 32
    x = jax.random.normal(kx, (B, T, H), dtype=jnp.float32)
    duration = jnp.array(
        [[1, 2, 0, 3, 1, 2, 1, 2],
         [2, 1, 1, 1, 2, 0, 3, 1]], dtype=jnp.int32)

    out, mel_pos = length_regulator(x, duration)
    out = jax.block_until_ready(out)
    mel_pos = jax.block_until_ready(mel_pos)

    ref_out, ref_pos = _reference(x, duration)
    assert out.shape == ref_out.shape, (out.shape, ref_out.shape)
    assert mel_pos.shape == ref_pos.shape, (mel_pos.shape, ref_pos.shape)
    np.testing.assert_allclose(np.asarray(out), ref_out, rtol=1e-5, atol=1e-5)
    np.testing.assert_array_equal(np.asarray(mel_pos), ref_pos)

    # --- bf16 compute path (halves HBM bytes / MXU passes) -------------------
    out_bf, pos_bf = length_regulator(x, duration, compute_dtype=jnp.bfloat16)
    out_bf = jax.block_until_ready(out_bf)
    assert out_bf.dtype == jnp.bfloat16
    np.testing.assert_allclose(np.asarray(out_bf.astype(jnp.float32)), ref_out,
                               rtol=5e-2, atol=5e-2)
    np.testing.assert_array_equal(np.asarray(pos_bf), ref_pos)

    # --- multi-tile + lane-aligned H (H % 128 == 0 -> no post-kernel slice) --
    B2, T2, H2 = 2, 16, 128
    x2 = jax.random.normal(kx2, (B2, T2, H2), dtype=jnp.float32)
    dur2 = jax.random.randint(kd2, (B2, T2), 0, 6).astype(jnp.int32)
    out2, pos2 = length_regulator(x2, dur2, tile_l=32)   # forces several l tiles
    out2 = jax.block_until_ready(out2)
    ref_out2, ref_pos2 = _reference(x2, dur2)
    assert out2.shape == ref_out2.shape, (out2.shape, ref_out2.shape)
    np.testing.assert_allclose(np.asarray(out2), ref_out2, rtol=1e-5, atol=1e-5)
    np.testing.assert_array_equal(np.asarray(pos2), ref_pos2)

    print("KERNEL_OK")
</pallas_src>

<mosaic_0001>
module attributes {stable_mosaic.version = 11 : i64} {
  func.func @_length_regulator_kernel(%arg0: i32, %arg1: i32, %arg2: memref<1x2x128xi32, #tpu.memory_space<vmem>>, %arg3: memref<1x128x128xf32, #tpu.memory_space<vmem>>, %arg4: memref<1x16x128xf32, #tpu.memory_space<vmem>>) attributes {dimension_semantics = [#tpu.dimension_semantics<parallel>, #tpu.dimension_semantics<parallel>], iteration_bounds = array<i64: 2, 1>, scalar_prefetch = 0 : i64, scratch_operands = 0 : i64, tpu.core_type = #tpu.core_type<tc>, window_params = [{transform_indices = @transform_0, window_bounds = array<i64: 1, 2, 128>}, {transform_indices = @transform_1, window_bounds = array<i64: 1, 128, 128>}, {transform_indices = @transform_2, window_bounds = array<i64: 1, 16, 128>}]} {
    %c0 = arith.constant 0 : index
    %c0_0 = arith.constant 0 : index
    %c0_1 = arith.constant 0 : index
    %0 = vector.load %arg2[%c0, %c0_0, %c0_1] : memref<1x2x128xi32, #tpu.memory_space<vmem>>, vector<1x1x128xi32>
    %1 = vector.shape_cast %0 : vector<1x1x128xi32> to vector<1x128xi32>
    %c0_2 = arith.constant 0 : index
    %c1 = arith.constant 1 : index
    %c0_3 = arith.constant 0 : index
    %2 = vector.load %arg2[%c0_2, %c1, %c0_3] : memref<1x2x128xi32, #tpu.memory_space<vmem>>, vector<1x1x128xi32>
    %3 = vector.shape_cast %2 : vector<1x1x128xi32> to vector<1x128xi32>
    %c16_i32 = arith.constant 16 : i32
    %4 = arith.muli %arg1, %c16_i32 : i32
    %5 = tpu.iota {dimensions = array<i32: 0>} : vector<16x1xi32>
    %6 = vector.broadcast %4 : i32 to vector<16x1xi32>
    %7 = arith.addi %6, %5 : vector<16x1xi32>
    %8 = vector.broadcast %7 : vector<16x1xi32> to vector<16x128xi32>
    %9 = vector.broadcast %1 : vector<1x128xi32> to vector<16x128xi32>
    %10 = arith.cmpi sge, %8, %9 : vector<16x128xi32>
    %11 = vector.broadcast %7 : vector<16x1xi32> to vector<16x128xi32>
    %12 = vector.broadcast %3 : vector<1x128xi32> to vector<16x128xi32>
    %13 = arith.cmpi slt, %11, %12 : vector<16x128xi32>
    %14 = arith.andi %10, %13 : vector<16x128xi1>
    %15 = arith.extui %14 : vector<16x128xi1> to vector<16x128xi32>
    %16 = arith.sitofp %15 : vector<16x128xi32> to vector<16x128xf32>
    %c0_4 = arith.constant 0 : index
    %c0_5 = arith.constant 0 : index
    %c0_6 = arith.constant 0 : index
    %17 = vector.load %arg3[%c0_4, %c0_5, %c0_6] : memref<1x128x128xf32, #tpu.memory_space<vmem>>, vector<1x128x128xf32>
    %18 = vector.shape_cast %17 : vector<1x128x128xf32> to vector<128x128xf32>
    %cst = arith.constant dense<0.000000e+00> : vector<16x128xf32>
    %19 = tpu.matmul %16, %18, %cst {dimension_numbers = #tpu.dot_dimension_numbers<[1], [0], [0], [1], [0, 0, 1, 1], [], []>} : vector<16x128xf32>, vector<128x128xf32>, vector<16x128xf32> -> vector<16x128xf32>
    %c0_7 = arith.constant 0 : index
    %c0_8 = arith.constant 0 : index
    %c0_9 = arith.constant 0 : index
    %20 = vector.load %arg4[%c0_7, %c0_8, %c0_9] : memref<1x16x128xf32, #tpu.memory_space<vmem>>, vector<1x16x128xf32>
    %21 = vector.shape_cast %20 : vector<1x16x128xf32> to vector<16x128xf32>
    %22 = vector.shape_cast %19 : vector<16x128xf32> to vector<1x16x128xf32>
    tpu.vector_store %arg4[%c0_7, %c0_8, %c0_9], %22 {strides = array<i32>} : memref<1x16x128xf32, #tpu.memory_space<vmem>>, vector<1x16x128xf32>,
    return
  }
  func.func @transform_0(%arg0: i32, %arg1: i32) -> (i32, i32, i32) {
    %c0_i32 = arith.constant 0 : i32
    %c0_i32_0 = arith.constant 0 : i32
    %c0_i32_1 = arith.constant 0 : i32
    return %arg0, %c0_i32, %c0_i32_0 : i32, i32, i32
  }
  func.func @transform_1(%arg0: i32, %arg1: i32) -> (i32, i32, i32) {
    %c0_i32 = arith.constant 0 : i32
    %c0_i32_0 = arith.constant 0 : i32
    %c0_i32_1 = arith.constant 0 : i32
    return %arg0, %c0_i32, %c0_i32_0 : i32, i32, i32
  }
  func.func @transform_2(%arg0: i32, %arg1: i32) -> (i32, i32, i32) {
    %c0_i32 = arith.constant 0 : i32
    %c0_i32_0 = arith.constant 0 : i32
    return %arg0, %arg1, %c0_i32 : i32, i32, i32
  }
}

</mosaic_0001>

<bundles_post_ra>
// kernel: _length_regulator_fixed.1
= control target key start
LH: loop header
LB: loop body
LE: loop exit
PB: predicated region body
PF: predicated region fallthrough
CT: control target
= control target key end

     0   :  { %s567_s9 = smov 0   ;;  %s569_s10 = smov 0   ;;  %s626_s0 = inlined_call_operand.vmem [shape: s32[2,2,128], index: 0, kind: input, shape index: {}]   ;;  %s627_s1 = inlined_call_operand.vmem [shape: f32[2,128,128], index: 1, kind: input, shape index: {}]   ;;  %s628_s2 = inlined_call_operand.vmem [shape: f32[2,12,128], index: 2, kind: output, shape index: {}]  }
   0x1   :  { %s571_s11 = smov 0  }
   0x2 LB: > { %s24_s12 = sadd.s32 1, %s545_s10  ;;  %p401_p0 = scmp.ge.s32.totalorder %s549_s11, 1  ;;  %s549_s11 = sphi %s571_s11, %s12_s11   ;;  %s545_s10 = sphi %s569_s10, %s630_s10   ;;  %s541_s9 = sphi %s567_s9, %s629_s9  }
   0x3   : > { %p26_p1 = scmp.ge.s32.totalorder %s24_s12, 2  ;;  %p135_p2 = scmp.lt.s32.totalorder %s549_s11, 3 }
   0x5   : > { %s632_s12 = smov (%p26_p1, %s24_s12), 0  ;;  %p136_p3 = pnand %p401_p0, %p135_p2 }
   0x6   : > { %p165_p4 = scmp.lt.s32.totalorder (!%p136_p3), %s541_s9, 1  ;;  %v187_v0 = vlaneseq (!%p136_p3)  ;;  %v551_v15 = vmov (!%p136_p3), 1.0  }
   0x7   : > { %139 = sbr.rel (%p136_p3) target bundleno = 266 (0x10a), region = 28 }
   0x8   : > { %v188_v9 = vshrl.u32 (!%p136_p3), %v187_v0, 7 }
   0xa   : > { %v189_v29 = vadd.s32 (!%p136_p3), 8, %v188_v9 }
   0xe   : > { %s634_s9 = smov (!%p165_p4, %s541_s9), 1 }
   0xf   : > { %s415_s13 = sshll.u32 %s634_s9, 7  ;;  %s402_s17 = sshll.u32 %s634_s9, 1 }
  0x10   : > { %s591_s16 = scalar_lea.vmem %s627_s1, %s415_s13  ;;  %s168_s20 = scalar_lea.vmem %s626_s0, %s402_s17 }
  0x11   : > { %v211_v1 = vld [vmem:[%s591_s16] sm:$0xff]  ;;  %v212_v2 = vld [vmem:[%s591_s16 + $0x8] sm:$0xff]  ;;  %v213_v3 = vld [vmem:[%s591_s16 + $0x10] sm:$0xff]  ;;  %s416_s21 = sshll.u32 %s634_s9, 4 }
  0x12   : > { %v470_v4 = vpack.c.bf16 %v212_v2, %v211_v1  ;;  %v214_v5 = vld [vmem:[%s591_s16 + $0x18] sm:$0xff]  ;;  %v215_v7 = vld [vmem:[%s591_s16 + $0x20] sm:$0xff]  ;;  %v216_v8 = vld [vmem:[%s591_s16 + $0x28] sm:$0xff]  ;;  %s182_s24 = scalar_lea.vmem %s628_s2, %s416_s21 }
  0x13   : > { %v474_v6 = vpack.c.bf16 %v214_v5, %v213_v3  ;;  %v478_v10 = vpack.c.bf16 %v216_v8, %v215_v7  ;;  %v407_v11 = vld [vmem:[%s168_s20] ss:$0 sm:$0xff]  ;;  %v408_v12 = vld [vmem:[%s168_s20 + $0x1] ss:$0 sm:$0xff]  ;;  %v217_v13 = vld [vmem:[%s591_s16 + $0x30] sm:$0xff] }
  0x14   : > { %471 = vmatprep.subr.bf16.mxu0 %v470_v4  ;;  %v218_v14 = vld [vmem:[%s591_s16 + $0x38] sm:$0xff]  ;;  %vm197_vm0 = vcmp.ge.s32.totalorder %v188_v9, %v407_v11  ;;  %vm203_vm1 = vcmp.lt.s32.totalorder %v188_v9, %v408_v12  ;;  %v219_v17 = vld [vmem:[%s591_s16 + $0x40] sm:$0xff]  ;;  %v220_v18 = vld [vmem:[%s591_s16 + $0x48] sm:$0xff]  ;;  %vm198_vm3 = vcmp.ge.s32.totalorder %v189_v29, %v407_v11  ;;  %vm204_vm4 = vcmp.lt.s32.totalorder %v189_v29, %v408_v12 }
  0x15   : > { %473 = vmatpush3.bf16.msra.mxu0 %v470_v4  ;;  %vm205_vm2 = vmand %vm197_vm0, %vm203_vm1  ;;  %v482_v16 = vpack.c.bf16 %v218_v14, %v217_v13  ;;  %v486_v19 = vpack.c.bf16 %v220_v18, %v219_v17  ;;  %v221_v20 = vld [vmem:[%s591_s16 + $0x50] sm:$0xff]  ;;  %v222_v21 = vld [vmem:[%s591_s16 + $0x58] sm:$0xff] }
  0x16   : > { %475 = vmatprep.subr.bf16.mxu0 %v474_v6  ;;  %467 = vmatprep.mubr.msk.f32.mxu0 %vm205_vm2, %v551_v15  ;;  %v490_v22 = vpack.c.bf16 %v222_v21, %v221_v20  ;;  %v223_v23 = vld [vmem:[%s591_s16 + $0x60] sm:$0xff]  ;;  %v224_v24 = vld [vmem:[%s591_s16 + $0x68] sm:$0xff]  ;;  %v225_v26 = vld [vmem:[%s591_s16 + $0x70] sm:$0xff] }
  0x17   : > { %v494_v25 = vpack.c.bf16 %v224_v24, %v223_v23  ;;  %v226_v27 = vld [vmem:[%s591_s16 + $0x78] sm:$0xff]  ;;  %vm206_vm5 = vmand %vm198_vm3, %vm204_vm4 }
  0x18   : > { %v498_v28 = vpack.c.bf16 %v226_v27, %v225_v26 }
  0x19   : > { %477 = vmatpush3.bf16.msra.mxu0 %v474_v6 }
  0x1a   : > { %479 = vmatprep.subr.bf16.mxu0 %v478_v10 }
  0x1d   : > { %481 = vmatpush3.bf16.msra.mxu0 %v478_v10 }
  0x1e   : > { %483 = vmatprep.subr.bf16.mxu0 %v482_v16 }
  0x21   : > { %485 = vmatpush3.bf16.msra.mxu0 %v482_v16 }
  0x22   : > { %487 = vmatprep.subr.bf16.mxu0 %v486_v19 }
  0x25   : > { %489 = vmatpush3.bf16.msra.mxu0 %v486_v19 }
  0x26   : > { %491 = vmatprep.subr.bf16.mxu0 %v490_v22 }
  0x29   : > { %493 = vmatpush3.bf16.msra.mxu0 %v490_v22 }
  0x2a   : > { %495 = vmatprep.subr.bf16.mxu0 %v494_v25 }
  0x2d   : > { %497 = vmatpush3.bf16.msra.mxu0 %v494_v25 }
  0x2e   : > { %499 = vmatprep.subr.bf16.mxu0 %v498_v28 }
  0x31   : > { %501 = vmatpush3.bf16.msra.mxu0 %v498_v28 }
  0x34   : > { %468 = vmatmul.mubr.msk.f32.vlgmr.msra.gmra.mrb[0].mxu0 %vm206_vm5, %v551_v15 }
 0x107   : > { %v469_v30 = vpop.f32.mrb[0].mxu0 }
 0x108   : > { %303 = vst [vmem:[%s182_s24 + $0x8] sm:$0xff] %v469_v30  ;;  %v293_v31 = vpop.f32.mrb[1].mxu0 }
 0x109   : > { %302 = vst [vmem:[%s182_s24] sm:$0xff] %v293_v31 }
 0x10a PF: > { %s12_s11 = sadd.s32 1, %s549_s11   ;;  %s629_s9 = smov %s545_s10 }
 0x10b   : > { %p9_p5 = scmp.ge.s32.totalorder %s12_s11, 4   ;;  %s630_s10 = smov %s632_s12 }
 0x10d   :  { %11 = sbr.rel (!%p9_p5) target bundleno = 2 (0x2), region = 61 }

</bundles_post_ra>
